<compile_context>
chip_gen: v7x
topology: tpu7x:2x2x1
jax: 0.10.0
libtpu: 0.0.40
codegen_flags: <defaults>
</compile_context>

<pallas_src>
import jax
import jax.numpy as jnp
from jax.experimental import pallas as pl
from jax.experimental.pallas import tpu as pltpu

C_IN = 256        # conv in-channels
C_OUT = 3         # conv out-channels
C_OUT_PAD = 8     # sublane-padded out-channels (kernel-internal)
MAX_T_HW = 2048   # max lane tile along the flattened spatial axis


def _round_up(x, m):
    return ((x + m - 1) // m) * m


def _pick_hw_tiling(hw):
    """Largest lane tile (multiple of 128, <= MAX_T_HW) with small pad waste."""
    for t in (MAX_T_HW, 1024, 512, 256, 128):
        hw_pad = _round_up(hw, t)
        if hw_pad - hw <= max(hw // 16, 0):   # <= ~6% zero-padding overhead
            return t, hw_pad
    return 128, _round_up(hw, 128)


def _conv1x1_tanh_kernel(x_ref, w_ref, b_ref, o_ref):
    # x_ref: (C_IN, T_HW)      -- one sample's channels x spatial tile
    # w_ref: (C_OUT_PAD, C_IN) -- zero-padded 1x1-conv weight
    # b_ref: (C_OUT_PAD, 1)    -- zero-padded bias
    # o_ref: (C_OUT_PAD, T_HW)
    acc = jnp.dot(w_ref[...], x_ref[...], preferred_element_type=jnp.float32)
    o_ref[...] = jnp.tanh(acc + b_ref[...]).astype(o_ref.dtype)


def _conv1x1_tanh(x, w_pad, b_pad, t_hw):
    """x: (N, C_IN, HW_pad) f32 -> (N, C_OUT_PAD, HW_pad) f32."""
    n, c, hw_pad = x.shape
    assert c == C_IN and hw_pad % t_hw == 0
    return pl.pallas_call(
        _conv1x1_tanh_kernel,
        out_shape=jax.ShapeDtypeStruct((n, C_OUT_PAD, hw_pad), jnp.float32),
        grid_spec=pltpu.PrefetchScalarGridSpec(
            num_scalar_prefetch=0,
            grid=(n, hw_pad // t_hw),
            in_specs=[
                # leading batch dim squeezed out of the kernel ref
                pl.BlockSpec((None, C_IN, t_hw), lambda i, j: (i, 0, j)),
                pl.BlockSpec((C_OUT_PAD, C_IN), lambda i, j: (0, 0)),
                pl.BlockSpec((C_OUT_PAD, 1), lambda i, j: (0, 0)),
            ],
            out_specs=pl.BlockSpec((None, C_OUT_PAD, t_hw),
                                   lambda i, j: (i, 0, j)),
        ),
        compiler_params=pltpu.CompilerParams(
            dimension_semantics=("parallel", "parallel"),
            vmem_limit_bytes=32 * 1024 * 1024,
        ),
    )(x, w_pad, b_pad)


def _down_model(x_nchw, w_pad, b_pad):
    """Conv2d(256, 3, k=1) + Tanh on an NCHW input, via the Pallas kernel."""
    n, c, h, w = x_nchw.shape
    assert c == C_IN
    hw = h * w
    t_hw, hw_pad = _pick_hw_tiling(hw)
    x = x_nchw.reshape(n, c, hw)                      # free reshape, stays NCHW
    if hw_pad != hw:
        x = jnp.pad(x, ((0, 0), (0, 0), (0, hw_pad - hw)))
    y = _conv1x1_tanh(x, w_pad, b_pad, t_hw)          # (N, 8, HW_pad)
    return y[:, :C_OUT, :hw].reshape(n, C_OUT, h, w)  # (N, 3, H, W)


def inner_cos_forward(inp, w_pad, b_pad):
    """InnerCos.forward: apply down_model to both elements of the tuple."""
    inp0, inp1 = inp
    out0 = _down_model(inp0, w_pad, b_pad)
    out1 = _down_model(inp1, w_pad, b_pad)
    return out0, out1


def init_params(key):
    """Deterministic Conv2d(256, 3, 1) weight/bias, padded to 8 out-channels."""
    kw, kb = jax.random.split(key)
    # PyTorch Conv2d weight shape is (3, 256, 1, 1); we store it as (3, 256).
    bound = 1.0 / jnp.sqrt(jnp.float32(C_IN))
    w = jax.random.uniform(kw, (C_OUT, C_IN), jnp.float32, -bound, bound)
    b = jax.random.uniform(kb, (C_OUT,), jnp.float32, -bound, bound)
    w_pad = jnp.zeros((C_OUT_PAD, C_IN), jnp.float32).at[:C_OUT, :].set(w)
    b_pad = jnp.zeros((C_OUT_PAD, 1), jnp.float32).at[:C_OUT, 0].set(b)
    return w, b, w_pad, b_pad


if __name__ == "__main__":
    key = jax.random.PRNGKey(0)
    k0, k1, kp = jax.random.split(key, 3)

    N, H, W = 2, 16, 16
    inp0 = jax.random.normal(k0, (N, C_IN, H, W), jnp.float32)
    inp1 = jax.random.normal(k1, (N, C_IN, H, W), jnp.float32)

    w, b, w_pad, b_pad = init_params(kp)

    fwd = jax.jit(inner_cos_forward)
    out0, out1 = fwd((inp0, inp1), w_pad, b_pad)
    jax.block_until_ready((out0, out1))

    # Reference check in plain JAX (1x1 conv == channel matmul + bias, then tanh).
    def ref(x):
        y = jnp.einsum('nchw,oc->nohw', x, w) + b[None, :, None, None]
        return jnp.tanh(y)

    r0, r1 = ref(inp0), ref(inp1)
    assert out0.shape == (N, C_OUT, H, W) and out1.shape == (N, C_OUT, H, W)
    assert jnp.allclose(out0, r0, atol=1e-5), "mismatch on out0"
    assert jnp.allclose(out1, r1, atol=1e-5), "mismatch on out1"

    print("KERNEL_OK")
</pallas_src>

<mosaic_0001>
module attributes {stable_mosaic.version = 11 : i64} {
  func.func @_conv1x1_tanh_kernel(%arg0: i32, %arg1: i32, %arg2: memref<1x256x256xf32, #tpu.memory_space<vmem>>, %arg3: memref<8x256xf32, #tpu.memory_space<vmem>>, %arg4: memref<8x1xf32, #tpu.memory_space<vmem>>, %arg5: memref<1x8x256xf32, #tpu.memory_space<vmem>>) attributes {dimension_semantics = [#tpu.dimension_semantics<parallel>, #tpu.dimension_semantics<parallel>], iteration_bounds = array<i64: 2, 1>, scalar_prefetch = 0 : i64, scratch_operands = 0 : i64, tpu.core_type = #tpu.core_type<tc>, window_params = [{transform_indices = @transform_0, window_bounds = array<i64: 1, 256, 256>}, {pipeline_mode = #tpu.pipeline_mode<synchronous>, transform_indices = @transform_1, window_bounds = array<i64: 8, 256>}, {pipeline_mode = #tpu.pipeline_mode<synchronous>, transform_indices = @transform_2, window_bounds = array<i64: 8, 1>}, {transform_indices = @transform_3, window_bounds = array<i64: 1, 8, 256>}]} {
    %c0 = arith.constant 0 : index
    %c0_0 = arith.constant 0 : index
    %0 = vector.load %arg3[%c0, %c0_0] : memref<8x256xf32, #tpu.memory_space<vmem>>, vector<8x256xf32>
    %c0_1 = arith.constant 0 : index
    %c0_2 = arith.constant 0 : index
    %c0_3 = arith.constant 0 : index
    %1 = vector.load %arg2[%c0_1, %c0_2, %c0_3] : memref<1x256x256xf32, #tpu.memory_space<vmem>>, vector<1x256x256xf32>
    %2 = vector.shape_cast %1 : vector<1x256x256xf32> to vector<256x256xf32>
    %cst = arith.constant dense<0.000000e+00> : vector<8x256xf32>
    %3 = tpu.matmul %0, %2, %cst {dimension_numbers = #tpu.dot_dimension_numbers<[1], [0], [0], [1], [0, 0, 1, 1], [], []>} : vector<8x256xf32>, vector<256x256xf32>, vector<8x256xf32> -> vector<8x256xf32>
    %c0_4 = arith.constant 0 : index
    %c0_5 = arith.constant 0 : index
    %4 = vector.load %arg4[%c0_4, %c0_5] : memref<8x1xf32, #tpu.memory_space<vmem>>, vector<8x1xf32>
    %5 = vector.broadcast %4 : vector<8x1xf32> to vector<8x256xf32>
    %6 = arith.addf %3, %5 : vector<8x256xf32>
    %7 = math.tanh %6 : vector<8x256xf32>
    %c0_6 = arith.constant 0 : index
    %c0_7 = arith.constant 0 : index
    %c0_8 = arith.constant 0 : index
    %8 = vector.load %arg5[%c0_6, %c0_7, %c0_8] : memref<1x8x256xf32, #tpu.memory_space<vmem>>, vector<1x8x256xf32>
    %9 = vector.shape_cast %8 : vector<1x8x256xf32> to vector<8x256xf32>
    %10 = vector.shape_cast %7 : vector<8x256xf32> to vector<1x8x256xf32>
    tpu.vector_store %arg5[%c0_6, %c0_7, %c0_8], %10 {strides = array<i32>} : memref<1x8x256xf32, #tpu.memory_space<vmem>>, vector<1x8x256xf32>,
    return
  }
  func.func @transform_0(%arg0: i32, %arg1: i32) -> (i32, i32, i32) {
    %c0_i32 = arith.constant 0 : i32
    %c0_i32_0 = arith.constant 0 : i32
    return %arg0, %c0_i32, %arg1 : i32, i32, i32
  }
  func.func @transform_1(%arg0: i32, %arg1: i32) -> (i32, i32) {
    %c0_i32 = arith.constant 0 : i32
    %c0_i32_0 = arith.constant 0 : i32
    %c0_i32_1 = arith.constant 0 : i32
    return %c0_i32, %c0_i32_0 : i32, i32
  }
  func.func @transform_2(%arg0: i32, %arg1: i32) -> (i32, i32) {
    %c0_i32 = arith.constant 0 : i32
    %c0_i32_0 = arith.constant 0 : i32
    %c0_i32_1 = arith.constant 0 : i32
    return %c0_i32, %c0_i32_0 : i32, i32
  }
  func.func @transform_3(%arg0: i32, %arg1: i32) -> (i32, i32, i32) {
    %c0_i32 = arith.constant 0 : i32
    %c0_i32_0 = arith.constant 0 : i32
    return %arg0, %c0_i32, %arg1 : i32, i32, i32
  }
}

</mosaic_0001>

<bundles_post_ra>
// kernel: inner_cos_forward.2
= control target key start
LH: loop header
LB: loop body
LE: loop exit
PB: predicated region body
PF: predicated region fallthrough
CT: control target
= control target key end

     0   :  { %s596_s12 = smov 0   ;;  %s598_s13 = smov 0   ;;  %s708_s0 = inlined_call_operand.vmem [shape: f32[2,256,256], index: 0, kind: input, shape index: {}]   ;;  %s709_s1 = inlined_call_operand.vmem [shape: f32[8,256], index: 1, kind: input, shape index: {}]   ;;  %s710_s2 = inlined_call_operand.vmem [shape: f32[8,1], index: 2, kind: input, shape index: {}]   ;;  %s711_s3 = inlined_call_operand.vmem [shape: f32[2,8,256], index: 3, kind: output, shape index: {}]  }
   0x1   :  { %s600_s14 = smov 0  }
   0x2 LB: > { %s25_s15 = sadd.s32 1, %s569_s13  ;;  %p448_p0 = scmp.ge.s32.totalorder %s573_s14, 1  ;;  %s573_s14 = sphi %s600_s14, %s13_s14   ;;  %s569_s13 = sphi %s598_s13, %s713_s13   ;;  %s565_s12 = sphi %s596_s12, %s712_s12  }
   0x3   : > { %p27_p1 = scmp.ge.s32.totalorder %s25_s15, 2  ;;  %p158_p2 = scmp.lt.s32.totalorder %s573_s14, 3 }
   0x5   : > { %s715_s15 = smov (%p27_p1, %s25_s15), 0  ;;  %p159_p3 = pnand %p448_p0, %p158_p2 }
   0x6   : > { %p191_p4 = scmp.lt.s32.totalorder (!%p159_p3), %s565_s12, 1  ;;  %v211_v0 = vld [vmem:[%s709_s1 + $0x8] sm:$0xff] (!%p159_p3)  ;;  %v276_v1 = vld [vmem:[%s710_s2] sm:$0xff] (!%p159_p3)  ;;  %v575_v2 = vmov (!%p159_p3), 0  }
   0x7   : > { %162 = sbr.rel (%p159_p3) target bundleno = 311 (0x137), region = 32  ;;  %346 = vmatprep.mubr.f32.mxu0 (!%p159_p3), %v211_v0  ;;  %546 = vset.pattern.permute.xlu0 (!%p159_p3), %v575_v2 }
   0x8   : > { %279 = vperm.xlu0 (!%p159_p3), %546, %v276_v1  }
   0xe   : > { %s717_s12 = smov (!%p191_p4, %s565_s12), 1 }
   0xf   : > { %s455_s20 = sshll.u32 %s717_s12, 9  ;;  %s456_s26 = sshll.u32 %s717_s12, 4 }
  0x10   : > { %s626_s23 = scalar_lea.vmem %s708_s0, %s455_s20  ;;  %s208_s29 = scalar_lea.vmem %s711_s3, %s456_s26 }
  0x11   : > { %v213_v3 = vld [vmem:[%s626_s23 + $0x8] sm:$0xff]  ;;  %v215_v4 = vld [vmem:[%s626_s23 + $0x18] sm:$0xff]  ;;  %v212_v5 = vld [vmem:[%s626_s23] sm:$0xff] }
  0x12   : > { %v457_v6 = vpack.c.bf16 %v215_v4, %v213_v3  ;;  %v214_v7 = vld [vmem:[%s626_s23 + $0x10] sm:$0xff]  ;;  %v217_v8 = vld [vmem:[%s626_s23 + $0x28] sm:$0xff]  ;;  %v219_v9 = vld [vmem:[%s626_s23 + $0x38] sm:$0xff] }
  0x13   : > { %v459_v10 = vpack.c.bf16 %v214_v7, %v212_v5  ;;  %v461_v11 = vpack.c.bf16 %v219_v9, %v217_v8  ;;  %v216_v12 = vld [vmem:[%s626_s23 + $0x20] sm:$0xff]  ;;  %v218_v13 = vld [vmem:[%s626_s23 + $0x30] sm:$0xff]  ;;  %v221_v14 = vld [vmem:[%s626_s23 + $0x48] sm:$0xff] }
  0x14   : > { %458 = vmatprep.subr.bf16.mxu0 %v457_v6  ;;  %v223_v15 = vld [vmem:[%s626_s23 + $0x58] sm:$0xff]  ;;  %v463_v16 = vpack.c.bf16 %v218_v13, %v216_v12  ;;  %v220_v18 = vld [vmem:[%s626_s23 + $0x40] sm:$0xff]  ;;  %v222_v19 = vld [vmem:[%s626_s23 + $0x50] sm:$0xff] }
  0x15   : > { %460 = vmatpush1.bf16.msra.mxu0 %v459_v10  ;;  %v465_v17 = vpack.c.bf16 %v223_v15, %v221_v14  ;;  %v225_v20 = vld [vmem:[%s626_s23 + $0x68] sm:$0xff]  ;;  %v227_v21 = vld [vmem:[%s626_s23 + $0x78] sm:$0xff]  ;;  %v467_v22 = vpack.c.bf16 %v222_v19, %v220_v18  ;;  %v224_v24 = vld [vmem:[%s626_s23 + $0x60] sm:$0xff] }
  0x16   : > { %462 = vmatprep.subr.bf16.mxu0 %v461_v11  ;;  %v469_v23 = vpack.c.bf16 %v227_v21, %v225_v20  ;;  %v226_v25 = vld [vmem:[%s626_s23 + $0x70] sm:$0xff]  ;;  %v229_v26 = vld [vmem:[%s626_s23 + $0x88] sm:$0xff]  ;;  %v231_v27 = vld [vmem:[%s626_s23 + $0x98] sm:$0xff] }
  0x17   : > { %v471_v28 = vpack.c.bf16 %v226_v25, %v224_v24  ;;  %v473_v29 = vpack.c.bf16 %v231_v27, %v229_v26  ;;  %v228_v30 = vld [vmem:[%s626_s23 + $0x80] sm:$0xff]  ;;  %v230_v31 = vld [vmem:[%s626_s23 + $0x90] sm:$0xff]  ;;  %v233_v32 = vld [vmem:[%s626_s23 + $0xa8] sm:$0xff] }
  0x18   : > { %v235_v33 = vld [vmem:[%s626_s23 + $0xb8] sm:$0xff]  ;;  %v475_v34 = vpack.c.bf16 %v230_v31, %v228_v30  ;;  %v232_v36 = vld [vmem:[%s626_s23 + $0xa0] sm:$0xff]  ;;  %v234_v37 = vld [vmem:[%s626_s23 + $0xb0] sm:$0xff] }
  0x19   : > { %464 = vmatpush1.bf16.msra.mxu0 %v463_v16  ;;  %v477_v35 = vpack.c.bf16 %v235_v33, %v233_v32  ;;  %v237_v38 = vld [vmem:[%s626_s23 + $0xc8] sm:$0xff]  ;;  %v239_v39 = vld [vmem:[%s626_s23 + $0xd8] sm:$0xff]  ;;  %v479_v40 = vpack.c.bf16 %v234_v37, %v232_v36  ;;  %v236_v42 = vld [vmem:[%s626_s23 + $0xc0] sm:$0xff] }
  0x1a   : > { %466 = vmatprep.subr.bf16.mxu0 %v465_v17  ;;  %v481_v41 = vpack.c.bf16 %v239_v39, %v237_v38  ;;  %v238_v43 = vld [vmem:[%s626_s23 + $0xd0] sm:$0xff]  ;;  %v241_v44 = vld [vmem:[%s626_s23 + $0xe8] sm:$0xff]  ;;  %v243_v45 = vld [vmem:[%s626_s23 + $0xf8] sm:$0xff] }
  0x1b   : > { %v483_v46 = vpack.c.bf16 %v238_v43, %v236_v42  ;;  %v485_v47 = vpack.c.bf16 %v243_v45, %v241_v44  ;;  %v240_v48 = vld [vmem:[%s626_s23 + $0xe0] sm:$0xff]  ;;  %v242_v49 = vld [vmem:[%s626_s23 + $0xf0] sm:$0xff]  ;;  %v245_v50 = vld [vmem:[%s626_s23 + $0x108] sm:$0xff] }
  0x1c   : > { %v247_v51 = vld [vmem:[%s626_s23 + $0x118] sm:$0xff]  ;;  %v487_v52 = vpack.c.bf16 %v242_v49, %v240_v48  ;;  %v244_v54 = vld [vmem:[%s626_s23 + $0x100] sm:$0xff]  ;;  %v246_v55 = vld [vmem:[%s626_s23 + $0x110] sm:$0xff] }
  0x1d   : > { %468 = vmatpush1.bf16.msra.mxu0 %v467_v22  ;;  %v489_v53 = vpack.c.bf16 %v247_v51, %v245_v50  ;;  %v249_v56 = vld [vmem:[%s626_s23 + $0x128] sm:$0xff]  ;;  %v251_v57 = vld [vmem:[%s626_s23 + $0x138] sm:$0xff]  ;;  %v491_v58 = vpack.c.bf16 %v246_v55, %v244_v54  ;;  %v248_v60 = vld [vmem:[%s626_s23 + $0x120] sm:$0xff] }
  0x1e   : > { %470 = vmatprep.subr.bf16.mxu0 %v469_v23  ;;  %v493_v59 = vpack.c.bf16 %v251_v57, %v249_v56  ;;  %v250_v61 = vld [vmem:[%s626_s23 + $0x130] sm:$0xff]  ;;  %v253_v62 = vld [vmem:[%s626_s23 + $0x148] sm:$0xff]  ;;  %v255_v63 = vld [vmem:[%s626_s23 + $0x158] sm:$0xff] }
  0x1f   : > { %v495_v0 = vpack.c.bf16 %v250_v61, %v248_v60  ;;  %v497_v1 = vpack.c.bf16 %v255_v63, %v253_v62  ;;  %v252_v2 = vld [vmem:[%s626_s23 + $0x140] sm:$0xff]  ;;  %v254_v3 = vld [vmem:[%s626_s23 + $0x150] sm:$0xff]  ;;  %v257_v4 = vld [vmem:[%s626_s23 + $0x168] sm:$0xff] }
  0x20   : > { %v259_v5 = vld [vmem:[%s626_s23 + $0x178] sm:$0xff]  ;;  %v499_v6 = vpack.c.bf16 %v254_v3, %v252_v2  ;;  %v256_v8 = vld [vmem:[%s626_s23 + $0x160] sm:$0xff]  ;;  %v258_v9 = vld [vmem:[%s626_s23 + $0x170] sm:$0xff] }
  0x21   : > { %472 = vmatpush1.bf16.msra.mxu0 %v471_v28  ;;  %v501_v7 = vpack.c.bf16 %v259_v5, %v257_v4  ;;  %v261_v10 = vld [vmem:[%s626_s23 + $0x188] sm:$0xff]  ;;  %v263_v11 = vld [vmem:[%s626_s23 + $0x198] sm:$0xff]  ;;  %v503_v12 = vpack.c.bf16 %v258_v9, %v256_v8  ;;  %v260_v14 = vld [vmem:[%s626_s23 + $0x180] sm:$0xff] }
  0x22   : > { %474 = vmatprep.subr.bf16.mxu0 %v473_v29  ;;  %v505_v13 = vpack.c.bf16 %v263_v11, %v261_v10  ;;  %v262_v15 = vld [vmem:[%s626_s23 + $0x190] sm:$0xff]  ;;  %v265_v16 = vld [vmem:[%s626_s23 + $0x1a8] sm:$0xff]  ;;  %v267_v17 = vld [vmem:[%s626_s23 + $0x1b8] sm:$0xff] }
  0x23   : > { %v507_v18 = vpack.c.bf16 %v262_v15, %v260_v14  ;;  %v509_v19 = vpack.c.bf16 %v267_v17, %v265_v16  ;;  %v264_v20 = vld [vmem:[%s626_s23 + $0x1a0] sm:$0xff]  ;;  %v266_v21 = vld [vmem:[%s626_s23 + $0x1b0] sm:$0xff]  ;;  %v269_v22 = vld [vmem:[%s626_s23 + $0x1c8] sm:$0xff] }
  0x24   : > { %v271_v23 = vld [vmem:[%s626_s23 + $0x1d8] sm:$0xff]  ;;  %v511_v24 = vpack.c.bf16 %v266_v21, %v264_v20  ;;  %v268_v26 = vld [vmem:[%s626_s23 + $0x1c0] sm:$0xff]  ;;  %v270_v27 = vld [vmem:[%s626_s23 + $0x1d0] sm:$0xff] }
  0x25   : > { %476 = vmatpush1.bf16.msra.mxu0 %v475_v34  ;;  %v513_v25 = vpack.c.bf16 %v271_v23, %v269_v22  ;;  %v273_v28 = vld [vmem:[%s626_s23 + $0x1e8] sm:$0xff]  ;;  %v275_v29 = vld [vmem:[%s626_s23 + $0x1f8] sm:$0xff]  ;;  %v515_v30 = vpack.c.bf16 %v270_v27, %v268_v26  ;;  %v272_v32 = vld [vmem:[%s626_s23 + $0x1e0] sm:$0xff] }
  0x26   : > { %478 = vmatprep.subr.bf16.mxu0 %v477_v35  ;;  %v517_v31 = vpack.c.bf16 %v275_v29, %v273_v28  ;;  %v274_v33 = vld [vmem:[%s626_s23 + $0x1f0] sm:$0xff]  ;;  %v210_v35 = vld [vmem:[%s709_s1] sm:$0xff] }
  0x27   : > { %v519_v34 = vpack.c.bf16 %v274_v33, %v272_v32 }
  0x29   : > { %480 = vmatpush1.bf16.msra.mxu0 %v479_v40 }
  0x2a   : > { %482 = vmatprep.subr.bf16.mxu0 %v481_v41 }
  0x2d   : > { %484 = vmatpush1.bf16.msra.mxu0 %v483_v46 }
  0x2e   : > { %486 = vmatprep.subr.bf16.mxu0 %v485_v47 }
  0x31   : > { %488 = vmatpush1.bf16.msra.mxu0 %v487_v52 }
  0x32   : > { %490 = vmatprep.subr.bf16.mxu0 %v489_v53 }
  0x35   : > { %492 = vmatpush1.bf16.msra.mxu0 %v491_v58 }
  0x36   : > { %494 = vmatprep.subr.bf16.mxu0 %v493_v59 }
  0x39   : > { %496 = vmatpush1.bf16.msra.mxu0 %v495_v0 }
  0x3a   : > { %498 = vmatprep.subr.bf16.mxu0 %v497_v1 }
  0x3d   : > { %500 = vmatpush1.bf16.msra.mxu0 %v499_v6 }
  0x3e   : > { %502 = vmatprep.subr.bf16.mxu0 %v501_v7 }
  0x41   : > { %504 = vmatpush1.bf16.msra.mxu0 %v503_v12 }
  0x42   : > { %506 = vmatprep.subr.bf16.mxu0 %v505_v13 }
  0x45   : > { %508 = vmatpush1.bf16.msra.mxu0 %v507_v18 }
  0x46   : > { %510 = vmatprep.subr.bf16.mxu0 %v509_v19 }
  0x49   : > { %512 = vmatpush1.bf16.msra.mxu0 %v511_v24 }
  0x4a   : > { %514 = vmatprep.subr.bf16.mxu0 %v513_v25 }
  0x4d   : > { %516 = vmatpush1.bf16.msra.mxu0 %v515_v30 }
  0x4e   : > { %518 = vmatprep.subr.bf16.mxu0 %v517_v31 }
  0x51   : > { %520 = vmatpush1.bf16.msra.mxu0 %v519_v34 }
  0x54   : > { %347 = vmatmul.mubr.f32.vlgmr.msra.gmra.mrb[0].mxu0 %v210_v35 }
  0x87   : > { %v280_v36 = vpop.permute.xlu0 %279 }
 0x127   : > { %v348_v37 = vpop.f32.mrb[0].mxu0 }
 0x128   : > { %v349_v38 = vadd.f32 %v348_v37, %v280_v36  ;;  %v350_v39 = vpop.f32.mrb[1].mxu0 }
 0x129   : > { %v351_v40 = vadd.f32 %v350_v39, %v280_v36 }
 0x12a   : > { %547 = vtanh.f32 %v349_v38 }
 0x12b   : > { %549 = vtanh.f32 %v351_v40 }
 0x134   : > { %v548_v41 = vpop.eup %547 }
 0x135   : > { %v550_v42 = vpop.eup %549  ;;  %355 = vst [vmem:[%s208_s29] sm:$0xff] %v548_v41 }
 0x136   : > { %356 = vst [vmem:[%s208_s29 + $0x8] sm:$0xff] %v550_v42 }
 0x137 PF: > { %s13_s14 = sadd.s32 1, %s573_s14   ;;  %s712_s12 = smov %s569_s13 }
 0x138   : > { %p10_p5 = scmp.ge.s32.totalorder %s13_s14, 4   ;;  %s713_s13 = smov %s715_s15 }
 0x13a   :  { %12 = sbr.rel (!%p10_p5) target bundleno = 2 (0x2), region = 62 }

</bundles_post_ra>
